<compile_context>
chip_gen: v7x
topology: tpu7x:2x2x1
jax: 0.10.0
libtpu: 0.0.40
codegen_flags: <defaults>
</compile_context>

<pallas_src>
import functools

import jax
import jax.numpy as jnp
from jax import lax
from jax.experimental import pallas as pl
from jax.experimental.pallas import tpu as pltpu


# ----------------------------------------------------------------------------
# Pallas kernel: full CNNDecoder forward for one block of Bb sequences.
# Activations are channels-last and flattened to (Bb*positions, channels) so
# every conv is a single big MXU matmul.
# ----------------------------------------------------------------------------
def _cnn_decoder_kernel(x_ref, w1_ref, b1_ref, w2_ref, b2_ref, wf_ref, bf_ref,
                        o_ref, y1_s, y2_s, *, L):
    L2, L4 = L // 2, L // 4
    N = x_ref.shape[1]            # Bb * L
    Bb = N // L
    NL2 = Bb * L2

    h = x_ref[0]                  # (N, D) f32, rows ordered (b, l)

    # ---- conv1 (k=3, pad=1): fused taps, one K=3D matmul --------------------
    # Per-sequence boundary masks, built once per block (rows where l==0 /
    # l==L-1 must see zero padding; these also kill cross-sequence roll bleed).
    lidx1 = lax.rem(lax.broadcasted_iota(jnp.int32, (N, 1), 0), L)
    not_first1 = (lidx1 != 0).astype(h.dtype)          # (N, 1)
    not_last1 = (lidx1 != L - 1).astype(h.dtype)
    h_prev = pltpu.roll(h, 1, axis=0) * not_first1      # h[l-1]
    h_next = pltpu.roll(h, N - 1, axis=0) * not_last1   # h[l+1]
    h_cat = jnp.concatenate([h_prev, h, h_next], axis=1)            # (N, 3D)
    y1 = jnp.dot(h_cat, w1_ref[...], preferred_element_type=jnp.float32)
    y1 = jnp.maximum(y1 + b1_ref[...], 0.0)                         # (N, F)
    y1_s[...] = y1

    # ---- maxpool1 (k=2, s=2): strided sublane reads from VMEM scratch ------
    p1 = jnp.maximum(y1_s[pl.ds(0, NL2, stride=2), :],
                     y1_s[pl.ds(1, NL2, stride=2), :])              # (NL2, F)

    # ---- conv2 (k=3, pad=1): fused taps ------------------------------------
    lidx2 = lax.rem(lax.broadcasted_iota(jnp.int32, (NL2, 1), 0), L2)
    not_first2 = (lidx2 != 0).astype(p1.dtype)
    not_last2 = (lidx2 != L2 - 1).astype(p1.dtype)
    p_prev = pltpu.roll(p1, 1, axis=0) * not_first2
    p_next = pltpu.roll(p1, NL2 - 1, axis=0) * not_last2
    p_cat = jnp.concatenate([p_prev, p1, p_next], axis=1)           # (NL2, 3F)
    y2 = jnp.dot(p_cat, w2_ref[...], preferred_element_type=jnp.float32)
    y2 = jnp.maximum(y2 + b2_ref[...], 0.0)                         # (NL2, F2)
    y2_s[...] = y2

    # ---- maxpool2 + flatten + fc: gather a (Bb, L4*F2) slab, one matmul ----
    # Position l of batch b lives at scratch rows b*L2 + 2l / b*L2 + 2l + 1;
    # a stride-L2 read pulls that position for all Bb batches at once.
    cols = []
    for l in range(L4):           # static, small (L4 positions)
        even = y2_s[pl.ds(2 * l, Bb, stride=L2), :]                 # (Bb, F2)
        odd = y2_s[pl.ds(2 * l + 1, Bb, stride=L2), :]
        cols.append(jnp.maximum(even, odd))
    p2 = jnp.concatenate(cols, axis=1)                              # (Bb, L4*F2)
    out = jnp.dot(p2, wf_ref[...], preferred_element_type=jnp.float32)
    o_ref[0] = out + bf_ref[...]                                    # (Bb, O_pad)


# ----------------------------------------------------------------------------
# Wrapper: batch-block picking, parameter plumbing, pallas_call.
# ----------------------------------------------------------------------------
def _pick_block_b(B, max_bb):
    """Largest divisor of B that is <= max_bb while keeping >=2 grid steps
    (so both v7x TensorCores get work) whenever B allows it."""
    target = max(1, min(max_bb, B // 2)) if B >= 2 else 1
    for bb in range(target, 0, -1):
        if B % bb == 0:
            return bb
    return 1


def cnn_decoder(x, kernel_params, output_dim, *, block_b=8):
    """x: (B, L, D) float32 hidden states. Returns (B, output_dim)."""
    w1cat, b1, w2cat, b2, wf2d, bf_pad = kernel_params
    B, L, D = x.shape
    if L % 4 != 0:
        # PyTorch MaxPool1d truncation for L % 4 != 0 is not reproduced here.
        raise ValueError(f"sequence length must be divisible by 4, got {L}")
    F = w1cat.shape[1]
    F2 = w2cat.shape[1]
    O_pad = wf2d.shape[1]
    L2, L4 = L // 2, L // 4

    Bb = _pick_block_b(B, block_b)
    nb = B // Bb
    x_blocks = x.reshape(nb, Bb * L, D)   # rows ordered (b, l) within a block

    kernel = functools.partial(_cnn_decoder_kernel, L=L)

    out = pl.pallas_call(
        kernel,
        out_shape=jax.ShapeDtypeStruct((nb, Bb, O_pad), jnp.float32),
        grid_spec=pltpu.PrefetchScalarGridSpec(
            num_scalar_prefetch=0,
            grid=(nb,),
            in_specs=[
                pl.BlockSpec((1, Bb * L, D), lambda i: (i, 0, 0)),   # x block
                pl.BlockSpec((3 * D, F), lambda i: (0, 0)),          # conv1 W
                pl.BlockSpec((1, F), lambda i: (0, 0)),              # conv1 b
                pl.BlockSpec((3 * F, F2), lambda i: (0, 0)),         # conv2 W
                pl.BlockSpec((1, F2), lambda i: (0, 0)),             # conv2 b
                pl.BlockSpec((L4 * F2, O_pad), lambda i: (0, 0)),    # fc W
                pl.BlockSpec((1, O_pad), lambda i: (0, 0)),          # fc b
            ],
            out_specs=pl.BlockSpec((1, Bb, O_pad), lambda i: (i, 0, 0)),
            scratch_shapes=[
                pltpu.VMEM((Bb * L, F), jnp.float32),    # conv1 output (pool1 src)
                pltpu.VMEM((Bb * L2, F2), jnp.float32),  # conv2 output (pool2 src)
            ],
        ),
        compiler_params=pltpu.CompilerParams(
            dimension_semantics=("parallel",)),
        # For real ESM sizes (D=1280, F=256) on v5e, also set
        # vmem_limit_bytes above the 16 MiB default scoped limit.
    )(x_blocks, w1cat, b1, w2cat, b2, wf2d, bf_pad)

    return out.reshape(B, O_pad)[:, :output_dim]


def init_params(key, input_dim, num_filters, seq_len, output_dim):
    """Deterministic synthetic weights in PyTorch shapes, plus kernel layouts."""
    F, F2 = num_filters, num_filters // 2
    L4 = seq_len // 4
    fc_in = F2 * L4   # PyTorch module hardcodes 6400 (= 128 * 50); generalized.
    k = jax.random.split(key, 6)
    w1 = jax.random.normal(k[0], (F, input_dim, 3), jnp.float32) * 0.05   # Conv1d
    b1 = jax.random.normal(k[1], (F,), jnp.float32) * 0.05
    w2 = jax.random.normal(k[2], (F2, F, 3), jnp.float32) * 0.05          # Conv1d
    b2 = jax.random.normal(k[3], (F2,), jnp.float32) * 0.05
    wf = jax.random.normal(k[4], (output_dim, fc_in), jnp.float32) * 0.05  # Linear
    bf = jax.random.normal(k[5], (output_dim,), jnp.float32) * 0.05

    # Kernel layouts.
    # conv weights: taps stacked along K -> rows [0:D)=prev, [D:2D)=center,
    # [2D:3D)=next, each as (Cin, Cout); matches the kernel's lane-concat.
    w1cat = jnp.transpose(w1, (2, 1, 0)).reshape(3 * input_dim, F)
    w2cat = jnp.transpose(w2, (2, 1, 0)).reshape(3 * F, F2)
    # fc weight: kernel's p2 slab columns are ordered (l, f); PyTorch flatten
    # order is (f, l) i.e. wf[o, f*L4 + l].  Pad O up to a lane-dense width.
    wf_lf = jnp.transpose(wf.reshape(output_dim, F2, L4),
                          (2, 1, 0)).reshape(L4 * F2, output_dim)
    O_pad = ((output_dim + 127) // 128) * 128
    wf2d = jnp.zeros((L4 * F2, O_pad), jnp.float32).at[:, :output_dim].set(wf_lf)
    bf_pad = jnp.zeros((1, O_pad), jnp.float32).at[0, :output_dim].set(bf)

    kernel_params = (w1cat, b1.reshape(1, F), w2cat, b2.reshape(1, F2),
                     wf2d, bf_pad)
    torch_params = (w1, b1, w2, b2, wf, bf)
    return kernel_params, torch_params


def esm_hidden_states_stub(sequences, embed_table):
    # TODO(synk): pretrained ESM masked-LM + HF tokenizer have no Pallas
    # equivalent; a deterministic embedding lookup stands in for the final
    # hidden states (B, L, input_dim).
    return embed_table[sequences]


# ----------------------------------------------------------------------------
# Pure-JAX reference of CNNDecoder (for correctness check).
# ----------------------------------------------------------------------------
def cnn_decoder_ref(x, w1, b1, w2, b2, wf, bf):
    xt = jnp.transpose(x, (0, 2, 1))                                      # (B, D, L)
    y = lax.conv_general_dilated(xt, w1, window_strides=(1,), padding=((1, 1),),
                                 dimension_numbers=('NCH', 'OIH', 'NCH'),
                                 precision=lax.Precision.HIGHEST)
    y = jnp.maximum(y + b1[None, :, None], 0.0)
    y = lax.reduce_window(y, -jnp.inf, lax.max, (1, 1, 2), (1, 1, 2), 'VALID')
    y = lax.conv_general_dilated(y, w2, window_strides=(1,), padding=((1, 1),),
                                 dimension_numbers=('NCH', 'OIH', 'NCH'),
                                 precision=lax.Precision.HIGHEST)
    y = jnp.maximum(y + b2[None, :, None], 0.0)
    y = lax.reduce_window(y, -jnp.inf, lax.max, (1, 1, 2), (1, 1, 2), 'VALID')
    flat = y.reshape(y.shape[0], -1)
    return jnp.dot(flat, wf.T, precision=lax.Precision.HIGHEST) + bf


if __name__ == "__main__":
    key = jax.random.PRNGKey(0)
    B, L_seq, D = 2, 16, 32          # batch, sequence length, hidden size
    num_filters, output_dim = 16, 1

    k_seq, k_emb, k_par = jax.random.split(key, 3)
    # "sequences" as in the PyTorch module: integer amino-acid codes.
    sequences = jax.random.randint(k_seq, (B, L_seq), 0, 20)
    embed_table = jax.random.normal(k_emb, (26, D), jnp.float32)
    hidden_states = esm_hidden_states_stub(sequences, embed_table)        # (B, L, D)

    kernel_params, torch_params = init_params(k_par, D, num_filters, L_seq,
                                              output_dim)

    out = cnn_decoder(hidden_states, kernel_params, output_dim)
    out = jax.block_until_ready(out)
    assert out.shape == (B, output_dim)

    ref = cnn_decoder_ref(hidden_states, *torch_params)
    if not bool(jnp.allclose(out, ref, rtol=1e-3, atol=1e-3)):
        raise AssertionError(f"mismatch: pallas={out} ref={ref}")
    print("KERNEL_OK")
</pallas_src>

<mosaic_0001>
module attributes {stable_mosaic.version = 11 : i64} {
  func.func @_cnn_decoder_kernel(%arg0: i32, %arg1: memref<1x16x32xf32, #tpu.memory_space<vmem>>, %arg2: memref<96x16xf32, #tpu.memory_space<vmem>>, %arg3: memref<1x16xf32, #tpu.memory_space<vmem>>, %arg4: memref<48x8xf32, #tpu.memory_space<vmem>>, %arg5: memref<1x8xf32, #tpu.memory_space<vmem>>, %arg6: memref<32x128xf32, #tpu.memory_space<vmem>>, %arg7: memref<1x128xf32, #tpu.memory_space<vmem>>, %arg8: memref<1x1x128xf32, #tpu.memory_space<vmem>>, %arg9: memref<16x16xf32, #tpu.memory_space<vmem>>, %arg10: memref<8x8xf32, #tpu.memory_space<vmem>>) attributes {dimension_semantics = [#tpu.dimension_semantics<parallel>], iteration_bounds = array<i64: 2>, scalar_prefetch = 0 : i64, scratch_operands = 2 : i64, tpu.core_type = #tpu.core_type<tc>, window_params = [{transform_indices = @transform_0, window_bounds = array<i64: 1, 16, 32>}, {pipeline_mode = #tpu.pipeline_mode<synchronous>, transform_indices = @transform_1, window_bounds = array<i64: 96, 16>}, {pipeline_mode = #tpu.pipeline_mode<synchronous>, transform_indices = @transform_2, window_bounds = array<i64: 1, 16>}, {pipeline_mode = #tpu.pipeline_mode<synchronous>, transform_indices = @transform_3, window_bounds = array<i64: 48, 8>}, {pipeline_mode = #tpu.pipeline_mode<synchronous>, transform_indices = @transform_4, window_bounds = array<i64: 1, 8>}, {pipeline_mode = #tpu.pipeline_mode<synchronous>, transform_indices = @transform_5, window_bounds = array<i64: 32, 128>}, {pipeline_mode = #tpu.pipeline_mode<synchronous>, transform_indices = @transform_6, window_bounds = array<i64: 1, 128>}, {transform_indices = @transform_7, window_bounds = array<i64: 1, 1, 128>}]} {
    %c0 = arith.constant 0 : index
    %c0_0 = arith.constant 0 : index
    %c0_1 = arith.constant 0 : index
    %0 = vector.load %arg1[%c0, %c0_0, %c0_1] : memref<1x16x32xf32, #tpu.memory_space<vmem>>, vector<1x16x32xf32>
    %1 = vector.shape_cast %0 : vector<1x16x32xf32> to vector<16x32xf32>
    %2 = tpu.iota {dimensions = array<i32: 0>} : vector<16x1xi32>
    %c16_i32 = arith.constant 16 : i32
    %3 = vector.broadcast %c16_i32 : i32 to vector<16x1xi32>
    %4 = arith.remsi %2, %3 : vector<16x1xi32>
    %c0_i32 = arith.constant 0 : i32
    %5 = vector.broadcast %c0_i32 : i32 to vector<16x1xi32>
    %6 = arith.cmpi ne, %4, %5 : vector<16x1xi32>
    %7 = arith.extui %6 : vector<16x1xi1> to vector<16x1xi32>
    %8 = arith.sitofp %7 : vector<16x1xi32> to vector<16x1xf32>
    %c15_i32 = arith.constant 15 : i32
    %9 = vector.broadcast %c15_i32 : i32 to vector<16x1xi32>
    %10 = arith.cmpi ne, %4, %9 : vector<16x1xi32>
    %11 = arith.extui %10 : vector<16x1xi1> to vector<16x1xi32>
    %12 = arith.sitofp %11 : vector<16x1xi32> to vector<16x1xf32>
    %c1_i32 = arith.constant 1 : i32
    %13 = tpu.dynamic_rotate %1 by %c1_i32 dim 0 : vector<16x32xf32>, i32 -> vector<16x32xf32>
    %14 = vector.broadcast %8 : vector<16x1xf32> to vector<16x32xf32>
    %15 = arith.mulf %13, %14 : vector<16x32xf32>
    %c15_i32_2 = arith.constant 15 : i32
    %16 = tpu.dynamic_rotate %1 by %c15_i32_2 dim 0 : vector<16x32xf32>, i32 -> vector<16x32xf32>
    %17 = vector.broadcast %12 : vector<16x1xf32> to vector<16x32xf32>
    %18 = arith.mulf %16, %17 : vector<16x32xf32>
    %19 = tpu.concatenate %15, %1, %18 in 1 : vector<16x32xf32>, vector<16x32xf32>, vector<16x32xf32> -> vector<16x96xf32>
    %c0_3 = arith.constant 0 : index
    %c0_4 = arith.constant 0 : index
    %20 = vector.load %arg2[%c0_3, %c0_4] : memref<96x16xf32, #tpu.memory_space<vmem>>, vector<96x16xf32>
    %cst = arith.constant dense<0.000000e+00> : vector<16x16xf32>
    %21 = tpu.matmul %19, %20, %cst {dimension_numbers = #tpu.dot_dimension_numbers<[1], [0], [0], [1], [0, 0, 1, 1], [], []>} : vector<16x96xf32>, vector<96x16xf32>, vector<16x16xf32> -> vector<16x16xf32>
    %c0_5 = arith.constant 0 : index
    %c0_6 = arith.constant 0 : index
    %22 = vector.load %arg3[%c0_5, %c0_6] : memref<1x16xf32, #tpu.memory_space<vmem>>, vector<1x16xf32>
    %23 = vector.broadcast %22 : vector<1x16xf32> to vector<16x16xf32>
    %24 = arith.addf %21, %23 : vector<16x16xf32>
    %cst_7 = arith.constant 0.000000e+00 : f32
    %25 = vector.broadcast %cst_7 : f32 to vector<16x16xf32>
    %26 = arith.maximumf %24, %25 : vector<16x16xf32>
    %c0_8 = arith.constant 0 : index
    %c0_9 = arith.constant 0 : index
    %27 = vector.load %arg9[%c0_8, %c0_9] : memref<16x16xf32, #tpu.memory_space<vmem>>, vector<16x16xf32>
    tpu.vector_store %arg9[%c0_8, %c0_9], %26 {strides = array<i32>} : memref<16x16xf32, #tpu.memory_space<vmem>>, vector<16x16xf32>,
    %c0_10 = arith.constant 0 : index
    %c0_11 = arith.constant 0 : index
    %28 = tpu.strided_load %arg9[%c0_10, %c0_11] {strides = array<i32: 2, 1>} : memref<16x16xf32, #tpu.memory_space<vmem>>, vector<8x16xf32>
    %c1 = arith.constant 1 : index
    %c0_12 = arith.constant 0 : index
    %29 = tpu.strided_load %arg9[%c1, %c0_12] {strides = array<i32: 2, 1>} : memref<16x16xf32, #tpu.memory_space<vmem>>, vector<8x16xf32>
    %30 = arith.maximumf %28, %29 : vector<8x16xf32>
    %31 = tpu.iota {dimensions = array<i32: 0>} : vector<8x1xi32>
    %c8_i32 = arith.constant 8 : i32
    %32 = vector.broadcast %c8_i32 : i32 to vector<8x1xi32>
    %33 = arith.remsi %31, %32 : vector<8x1xi32>
    %c0_i32_13 = arith.constant 0 : i32
    %34 = vector.broadcast %c0_i32_13 : i32 to vector<8x1xi32>
    %35 = arith.cmpi ne, %33, %34 : vector<8x1xi32>
    %36 = arith.extui %35 : vector<8x1xi1> to vector<8x1xi32>
    %37 = arith.sitofp %36 : vector<8x1xi32> to vector<8x1xf32>
    %c7_i32 = arith.constant 7 : i32
    %38 = vector.broadcast %c7_i32 : i32 to vector<8x1xi32>
    %39 = arith.cmpi ne, %33, %38 : vector<8x1xi32>
    %40 = arith.extui %39 : vector<8x1xi1> to vector<8x1xi32>
    %41 = arith.sitofp %40 : vector<8x1xi32> to vector<8x1xf32>
    %c1_i32_14 = arith.constant 1 : i32
    %42 = tpu.dynamic_rotate %30 by %c1_i32_14 dim 0 : vector<8x16xf32>, i32 -> vector<8x16xf32>
    %43 = vector.broadcast %37 : vector<8x1xf32> to vector<8x16xf32>
    %44 = arith.mulf %42, %43 : vector<8x16xf32>
    %c7_i32_15 = arith.constant 7 : i32
    %45 = tpu.dynamic_rotate %30 by %c7_i32_15 dim 0 : vector<8x16xf32>, i32 -> vector<8x16xf32>
    %46 = vector.broadcast %41 : vector<8x1xf32> to vector<8x16xf32>
    %47 = arith.mulf %45, %46 : vector<8x16xf32>
    %48 = tpu.concatenate %44, %30, %47 in 1 : vector<8x16xf32>, vector<8x16xf32>, vector<8x16xf32> -> vector<8x48xf32>
    %c0_16 = arith.constant 0 : index
    %c0_17 = arith.constant 0 : index
    %49 = vector.load %arg4[%c0_16, %c0_17] : memref<48x8xf32, #tpu.memory_space<vmem>>, vector<48x8xf32>
    %cst_18 = arith.constant dense<0.000000e+00> : vector<8x8xf32>
    %50 = tpu.matmul %48, %49, %cst_18 {dimension_numbers = #tpu.dot_dimension_numbers<[1], [0], [0], [1], [0, 0, 1, 1], [], []>} : vector<8x48xf32>, vector<48x8xf32>, vector<8x8xf32> -> vector<8x8xf32>
    %c0_19 = arith.constant 0 : index
    %c0_20 = arith.constant 0 : index
    %51 = vector.load %arg5[%c0_19, %c0_20] : memref<1x8xf32, #tpu.memory_space<vmem>>, vector<1x8xf32>
    %52 = vector.broadcast %51 : vector<1x8xf32> to vector<8x8xf32>
    %53 = arith.addf %50, %52 : vector<8x8xf32>
    %cst_21 = arith.constant 0.000000e+00 : f32
    %54 = vector.broadcast %cst_21 : f32 to vector<8x8xf32>
    %55 = arith.maximumf %53, %54 : vector<8x8xf32>
    %c0_22 = arith.constant 0 : index
    %c0_23 = arith.constant 0 : index
    %56 = vector.load %arg10[%c0_22, %c0_23] : memref<8x8xf32, #tpu.memory_space<vmem>>, vector<8x8xf32>
    tpu.vector_store %arg10[%c0_22, %c0_23], %55 {strides = array<i32>} : memref<8x8xf32, #tpu.memory_space<vmem>>, vector<8x8xf32>,
    %c0_24 = arith.constant 0 : index
    %c0_25 = arith.constant 0 : index
    %57 = tpu.strided_load %arg10[%c0_24, %c0_25] {strides = array<i32: 8, 1>} : memref<8x8xf32, #tpu.memory_space<vmem>>, vector<1x8xf32>
    %c1_26 = arith.constant 1 : index
    %c0_27 = arith.constant 0 : index
    %58 = tpu.strided_load %arg10[%c1_26, %c0_27] {strides = array<i32: 8, 1>} : memref<8x8xf32, #tpu.memory_space<vmem>>, vector<1x8xf32>
    %59 = arith.maximumf %57, %58 : vector<1x8xf32>
    %c2 = arith.constant 2 : index
    %c0_28 = arith.constant 0 : index
    %60 = tpu.strided_load %arg10[%c2, %c0_28] {strides = array<i32: 8, 1>} : memref<8x8xf32, #tpu.memory_space<vmem>>, vector<1x8xf32>
    %c3 = arith.constant 3 : index
    %c0_29 = arith.constant 0 : index
    %61 = tpu.strided_load %arg10[%c3, %c0_29] {strides = array<i32: 8, 1>} : memref<8x8xf32, #tpu.memory_space<vmem>>, vector<1x8xf32>
    %62 = arith.maximumf %60, %61 : vector<1x8xf32>
    %c4 = arith.constant 4 : index
    %c0_30 = arith.constant 0 : index
    %63 = tpu.strided_load %arg10[%c4, %c0_30] {strides = array<i32: 8, 1>} : memref<8x8xf32, #tpu.memory_space<vmem>>, vector<1x8xf32>
    %c5 = arith.constant 5 : index
    %c0_31 = arith.constant 0 : index
    %64 = tpu.strided_load %arg10[%c5, %c0_31] {strides = array<i32: 8, 1>} : memref<8x8xf32, #tpu.memory_space<vmem>>, vector<1x8xf32>
    %65 = arith.maximumf %63, %64 : vector<1x8xf32>
    %c6 = arith.constant 6 : index
    %c0_32 = arith.constant 0 : index
    %66 = tpu.strided_load %arg10[%c6, %c0_32] {strides = array<i32: 8, 1>} : memref<8x8xf32, #tpu.memory_space<vmem>>, vector<1x8xf32>
    %c7 = arith.constant 7 : index
    %c0_33 = arith.constant 0 : index
    %67 = tpu.strided_load %arg10[%c7, %c0_33] {strides = array<i32: 8, 1>} : memref<8x8xf32, #tpu.memory_space<vmem>>, vector<1x8xf32>
    %68 = arith.maximumf %66, %67 : vector<1x8xf32>
    %69 = tpu.concatenate %59, %62, %65, %68 in 1 : vector<1x8xf32>, vector<1x8xf32>, vector<1x8xf32>, vector<1x8xf32> -> vector<1x32xf32>
    %c0_34 = arith.constant 0 : index
    %c0_35 = arith.constant 0 : index
    %70 = vector.load %arg6[%c0_34, %c0_35] : memref<32x128xf32, #tpu.memory_space<vmem>>, vector<32x128xf32>
    %cst_36 = arith.constant dense<0.000000e+00> : vector<1x128xf32>
    %71 = tpu.matmul %69, %70, %cst_36 {dimension_numbers = #tpu.dot_dimension_numbers<[1], [0], [0], [1], [0, 0, 1, 1], [], []>} : vector<1x32xf32>, vector<32x128xf32>, vector<1x128xf32> -> vector<1x128xf32>
    %c0_37 = arith.constant 0 : index
    %c0_38 = arith.constant 0 : index
    %72 = vector.load %arg7[%c0_37, %c0_38] : memref<1x128xf32, #tpu.memory_space<vmem>>, vector<1x128xf32>
    %73 = arith.addf %71, %72 : vector<1x128xf32>
    %c0_39 = arith.constant 0 : index
    %c0_40 = arith.constant 0 : index
    %c0_41 = arith.constant 0 : index
    %74 = vector.load %arg8[%c0_39, %c0_40, %c0_41] : memref<1x1x128xf32, #tpu.memory_space<vmem>>, vector<1x1x128xf32>
    %75 = vector.shape_cast %74 : vector<1x1x128xf32> to vector<1x128xf32>
    %76 = vector.shape_cast %73 : vector<1x128xf32> to vector<1x1x128xf32>
    tpu.vector_store %arg8[%c0_39, %c0_40, %c0_41], %76 {strides = array<i32>} : memref<1x1x128xf32, #tpu.memory_space<vmem>>, vector<1x1x128xf32>,
    return
  }
  func.func @transform_0(%arg0: i32) -> (i32, i32, i32) {
    %c0_i32 = arith.constant 0 : i32
    %c0_i32_0 = arith.constant 0 : i32
    %c0_i32_1 = arith.constant 0 : i32
    return %arg0, %c0_i32, %c0_i32_0 : i32, i32, i32
  }
  func.func @transform_1(%arg0: i32) -> (i32, i32) {
    %c0_i32 = arith.constant 0 : i32
    %c0_i32_0 = arith.constant 0 : i32
    %c0_i32_1 = arith.constant 0 : i32
    return %c0_i32, %c0_i32_0 : i32, i32
  }
  func.func @transform_2(%arg0: i32) -> (i32, i32) {
    %c0_i32 = arith.constant 0 : i32
    %c0_i32_0 = arith.constant 0 : i32
    %c0_i32_1 = arith.constant 0 : i32
    return %c0_i32, %c0_i32_0 : i32, i32
  }
  func.func @transform_3(%arg0: i32) -> (i32, i32) {
    %c0_i32 = arith.constant 0 : i32
    %c0_i32_0 = arith.constant 0 : i32
    %c0_i32_1 = arith.constant 0 : i32
    return %c0_i32, %c0_i32_0 : i32, i32
  }
  func.func @transform_4(%arg0: i32) -> (i32, i32) {
    %c0_i32 = arith.constant 0 : i32
    %c0_i32_0 = arith.constant 0 : i32
    %c0_i32_1 = arith.constant 0 : i32
    return %c0_i32, %c0_i32_0 : i32, i32
  }
  func.func @transform_5(%arg0: i32) -> (i32, i32) {
    %c0_i32 = arith.constant 0 : i32
    %c0_i32_0 = arith.constant 0 : i32
    %c0_i32_1 = arith.constant 0 : i32
    return %c0_i32, %c0_i32_0 : i32, i32
  }
  func.func @transform_6(%arg0: i32) -> (i32, i32) {
    %c0_i32 = arith.constant 0 : i32
    %c0_i32_0 = arith.constant 0 : i32
    %c0_i32_1 = arith.constant 0 : i32
    return %c0_i32, %c0_i32_0 : i32, i32
  }
  func.func @transform_7(%arg0: i32) -> (i32, i32, i32) {
    %c0_i32 = arith.constant 0 : i32
    %c0_i32_0 = arith.constant 0 : i32
    %c0_i32_1 = arith.constant 0 : i32
    return %arg0, %c0_i32, %c0_i32_0 : i32, i32, i32
  }
}

</mosaic_0001>

<bundles_post_ra>
// kernel: tpu_custom_call.1
= control target key start
LH: loop header
LB: loop body
LE: loop exit
PB: predicated region body
PF: predicated region fallthrough
CT: control target
= control target key end

     0   :  { %12 = vsyncpa [#allocation5], 0  ;;  %s1259_s0 = inlined_call_operand.vmem [shape: f32[2,16,32], index: 0, kind: input, shape index: {}]   ;;  %s1260_s1 = inlined_call_operand.vmem [shape: f32[96,16], index: 1, kind: input, shape index: {}]   ;;  %s1261_s2 = inlined_call_operand.vmem [shape: f32[1,16], index: 2, kind: input, shape index: {}]   ;;  %s1262_s3 = inlined_call_operand.vmem [shape: f32[48,8], index: 3, kind: input, shape index: {}]   ;;  %s1263_s4 = inlined_call_operand.vmem [shape: f32[1,8], index: 4, kind: input, shape index: {}]   ;;  %s1264_s5 = inlined_call_operand.vmem [shape: f32[32,128], index: 5, kind: input, shape index: {}]   ;;  %s1265_s6 = inlined_call_operand.vmem [shape: f32[1,128], index: 6, kind: input, shape index: {}]   ;;  %s1266_s7 = inlined_call_operand.hbm [shape: f32[2,1,128], index: 7, kind: output, shape index: {}]  }
   0x1   :  { %14 = vsyncpa [#allocation5 + $0x1], 0  ;;  %s1050_s24 = smov 0   ;;  %s1052_s25 = smov 0  }
   0x2   :  { %s1054_s26 = smov 0   ;;  %s1056_s27 = smov 0  }
   0x3 LB: > { %s1071_s28 = sadd.s32 4294967295, %s999_s27   ;;  %s752_s29 = sadd.s32 4294967294, %s999_s27   ;;  %s999_s27 = sphi %s1056_s27, %s1272_s27   ;;  %s995_s26 = sphi %s1054_s26, %s1271_s26   ;;  %s991_s25 = sphi %s1052_s25, %s1270_s25   ;;  %s987_s24 = sphi %s1050_s24, %s1269_s24  }
   0x4   : > { %s1075_s30 = sadd.s32 1, %s999_s27   ;;  %s179_s8 = sadd.s32 1, %s995_s26 }
   0x5   : > { %s176_s9 = ssub.s32 %s999_s27, %s1075_s30  ;;  %p189_p0 = scmp.ne.s32.totalorder %s995_s26, %s991_s25 }
   0x6   : > { %p177_p1 = scmp.eq.s32.totalorder %s176_s9, 0  ;;  %p190_p2 = scmp.eq.s32.totalorder %s1071_s28, 1 }
   0x7   : > { %p195_p3 = scmp.ne.s32.totalorder %s991_s25, %s987_s24  ;;  %p196_p4 = scmp.eq.s32.totalorder %s752_s29, 1 }
   0x8   : > { %s1086_s10 = scalar_select %p177_p1, %s995_s26, %s179_s8  }
   0x9   : > { %p1088_p5 = por %p190_p2, %p189_p0  ;;  %p1092_p6 = por %p196_p4, %p195_p3 }
   0xa   : > { %p755_p7 = scmp.ge.s32.totalorder %s999_s27, 1  ;;  %p240_p8 = scmp.lt.s32.totalorder %s999_s27, 3 }
   0xc   : > { %p241_p9 = pnand %p755_p7, %p240_p8 }
   0xd   : > { %p271_p10 = scmp.lt.s32.totalorder (!%p241_p9), %s1071_s28, 1  ;;  %v278_v0 = vlaneseq (!%p241_p9)  ;;  %v343_v1 = vld [vmem:[%s1260_s1] sm:$0xff] (!%p241_p9)  ;;  %v344_v2 = vld [vmem:[%s1260_s1 + $0x8] sm:$0xff] (!%p241_p9)  ;;  %v345_v3 = vld [vmem:[%s1260_s1 + $0x10] sm:$0xff] (!%p241_p9)  ;;  %s1001_s20 = smov (!%p241_p9), 32   ;;  %v1002_v23 = vmov (!%p241_p9), 0.0  }
   0xe   : > { %244 = sbr.rel (%p241_p9) target bundleno = 1071 (0x42f), region = 48  ;;  %v851_v4 = vpack.c.bf16 (!%p241_p9), %v344_v2, %v343_v1  ;;  %v346_v5 = vld [vmem:[%s1260_s1 + $0x18] sm:$0xff] (!%p241_p9)  ;;  %v347_v8 = vld [vmem:[%s1260_s1 + $0x20] sm:$0xff] (!%p241_p9)  ;;  %v348_v9 = vld [vmem:[%s1260_s1 + $0x28] sm:$0xff] (!%p241_p9)  ;;  %vm337_vm4 = vcmask (!%p241_p9), 261120   ;;  %vm340_vm5 = vcmask (!%p241_p9), 523264  }
   0xf   : > { %v1112_v6 = vshrl.u32 (!%p241_p9), %v278_v0, 7  ;;  %v855_v7 = vpack.c.bf16 (!%p241_p9), %v346_v5, %v345_v3  ;;  %v859_v11 = vpack.c.bf16 (!%p241_p9), %v348_v9, %v347_v8  ;;  %v349_v12 = vld [vmem:[%s1260_s1 + $0x30] sm:$0xff] (!%p241_p9)  ;;  %v350_v13 = vld [vmem:[%s1260_s1 + $0x38] sm:$0xff] (!%p241_p9)  ;;  %v351_v28 = vld [vmem:[%s1260_s1 + $0x40] sm:$0xff] (!%p241_p9)  ;;  %vm362_vm6 = vcmask (!%p241_p9), 785408   ;;  %s1006_s17 = smov (!%p241_p9), 16  }
  0x10   : > { %852 = vmatprep.subr.bf16.mxu0 (!%p241_p9), %v851_v4  ;;  %v863_v21 = vpack.c.bf16 (!%p241_p9), %v350_v13, %v349_v12  ;;  %v352_v29 = vld [vmem:[%s1260_s1 + $0x48] sm:$0xff] (!%p241_p9)  ;;  %v353_v32 = vld [vmem:[%s1260_s1 + $0x50] sm:$0xff] (!%p241_p9)  ;;  %v354_v33 = vld [vmem:[%s1260_s1 + $0x58] sm:$0xff] (!%p241_p9)  ;;  %v1004_v49 = vmov (!%p241_p9), 0.0|0.0   ;;  %vm446_vm7 = vcmask (!%p241_p9), 130048   ;;  %vm1005_vm8 = vmmov (!%p241_p9), 0  }
  0x11   : > { %v280_v10 = vadd.s32 (!%p241_p9), 8, %v1112_v6  ;;  %854 = vmatpush3.bf16.msra.mxu0 (!%p241_p9), %v851_v4  ;;  %vm316_vm0 = vcmp.lt.s32.totalorder (!%p241_p9), %v1112_v6, 7  ;;  %vm309_vm1 = vcmp.lt.s32.totalorder (!%p241_p9), %v1112_v6, 1  ;;  %v867_v31 = vpack.c.bf16 (!%p241_p9), %v352_v29, %v351_v28  ;;  %v480_v46 = vld [vmem:[%s1262_s3] sm:$0xff] (!%p241_p9)  ;;  %v481_v47 = vld [vmem:[%s1262_s3 + $0x8] sm:$0xff] (!%p241_p9)  ;;  %v482_v48 = vld [vmem:[%s1262_s3 + $0x10] sm:$0xff] (!%p241_p9)  ;;  %875 = vmatprep.subr.bf16.mxu1 (!%p241_p9), %v1004_v49 }
  0x12   : > { %856 = vmatprep.subr.bf16.mxu0 (!%p241_p9), %v855_v7  ;;  %v871_v34 = vpack.c.bf16 (!%p241_p9), %v354_v33, %v353_v32  ;;  %v285_v35 = vand.u32 (!%p241_p9), 15, %v1112_v6  ;;  %v876_v50 = vpack.c.bf16 (!%p241_p9), %v481_v47, %v480_v46  ;;  %v483_v51 = vld [vmem:[%s1262_s3 + $0x18] sm:$0xff] (!%p241_p9)  ;;  %v760_v53 = vld [vmem:[%s1261_s2] ss:$0 sm:$0xff] (!%p241_p9)  ;;  %v485_v59 = vld [vmem:[%s1262_s3 + $0x28] sm:$0xff] (!%p241_p9)  ;;  %837 = vmatprep.mubr.msk.f32.mxu1 (!%p241_p9), %vm1005_vm8, %v1002_v23  ;;  %v457_v63 = vand.u32 (!%p241_p9), 7, %v1112_v6 }
  0x13   : > { %v292_v16 = vand.u32 (!%p241_p9), 15, %v280_v10  ;;  %v879_v52 = vpack.c.bf16 (!%p241_p9), %v483_v51, %v482_v48  ;;  %v484_v58 = vld [vmem:[%s1262_s3 + $0x20] sm:$0xff] (!%p241_p9)  ;;  %vm493_vm11 = vcmask (!%p241_p9), 392192   ;;  %vm568_vm12 = vcmask (!%p241_p9), 64512   ;;  %s1007_s14 = smov (!%p241_p9), 8   ;;  %s269_s16 = sand.u32 (!%p241_p9), 1, %s991_s25  }
  0x14   : > { %vm295_vm3 = vcmp.ne.s32.totalorder (!%p241_p9), %v285_v35, 0  ;;  %877 = vmatpush3.bf16.msra.mxu1 (!%p241_p9), %v876_v50  ;;  %v882_v61 = vpack.c.bf16 (!%p241_p9), %v485_v59, %v484_v58  ;;  %vm463_vm9 = vcmp.ne.s32.totalorder (!%p241_p9), %v457_v63, 7  ;;  %vm460_vm10 = vcmp.ne.s32.totalorder (!%p241_p9), %v457_v63, 0  ;;  %v605_v13 = vld [vmem:[%s1264_s5] sm:$0xff] (!%p241_p9)  ;;  %s768_s19 = sshll.u32 (!%p241_p9), %s1071_s28, 4  ;;  %s685_s8 = scalar_lea.sflag (!%p241_p9), [#allocation5], %s269_s16 }
  0x15   : > { %s272_s21 = scalar_select %p271_p10, %s1071_s28, 1  ;;  %vm302_vm2 = vcmp.ne.s32.totalorder %v292_v16, 15  ;;  %858 = vmatpush3.bf16.msra.mxu0 %v855_v7  ;;  %v758_v36 = vsel %vm295_vm3, 1.0, %v1002_v23  ;;  %878 = vmatprep.subr.bf16.mxu1 %v1004_v49  ;;  %v764_v3 = vsel %vm463_vm9, 1.0, %v1002_v23  ;;  %v763_v4 = vsel %vm460_vm10, 1.0, %v1002_v23 }
  0x16   : > { %v759_v24 = vsel %vm302_vm2, 1.0, %v1002_v23  ;;  %860 = vmatprep.subr.bf16.mxu0 %v859_v11  ;;  %v765_v16 = vld [vmem:[%s1263_s4] ss:$0 sm:$0xff]  ;;  %vm603_vm13 = vcmask 195584   ;;  %s1217_s29 = scalar_lea.hbm %s1266_s7, %s768_s19  ;;  %s1009_s28 = smov [#allocation4]  }
  0x17   : > { %s771_s9 = sshll.u32 %s272_s21, 4  ;;  %s1003_s21 = smov 64  }
  0x18   : > { %s275_s15 = scalar_lea.vmem %s1259_s0, %s771_s9  ;;  %880 = vmatpush3.bf16.msra.mxu1 %v879_v52  ;;  %s941_s13 = sshll.u32 %s1009_s28, 4  ;;  %s942_s13 = int_to_ptr.vmem [resolvable:$false] %s941_s13 }
  0x19   : > { %v276_v14 = vld [vmem:[%s275_s15] sm:$0xff]  ;;  %v277_v15 = vld [vmem:[%s275_s15 + $0x8] sm:$0xff]  ;;  %862 = vmatpush3.bf16.msra.mxu0 %v859_v11  ;;  %881 = vmatprep.subr.bf16.mxu1 %v1004_v49  ;;  %s1008_s15 = smov 24  }
  0x1a   : > { %v308_v17 = vrot.slane %v277_v15, 7  ;;  %323 = vrot.lane.b32.xlu0 %v276_v14, %s1001_s20  ;;  %v307_v18 = vrot.slane %v276_v14, 7  ;;  %v314_v19 = vrot.slane %v276_v14, 1  ;;  %v315_v20 = vrot.slane %v277_v15, 1  ;;  %864 = vmatprep.subr.bf16.mxu0 %v863_v21  ;;  %v606_v14 = vld [vmem:[%s1264_s5 + $0x8] sm:$0xff] }
  0x1c   : > { %v317_v22 = vsel %vm316_vm0, %v314_v19, %v315_v20  ;;  %v318_v25 = vsel %vm316_vm0, %v315_v20, %v314_v19  ;;  %v311_v26 = vsel %vm309_vm1, %v308_v17, %v307_v18  ;;  %v310_v30 = vsel %vm309_vm1, %v307_v18, %v308_v17  ;;  %883 = vmatpush3.bf16.msra.mxu1 %v882_v61 }
  0x1d   : > { %331 = vrot.lane.b32.xlu1 %v317_v22, %s1003_s21  ;;  %v320_v27 = vmul.f32 %v759_v24, %v318_v25  ;;  %866 = vmatpush3.bf16.msra.mxu0 %v863_v21  ;;  %v312_v37 = vmul.f32 %v758_v36, %v311_v26  ;;  %v607_v21 = vld [vmem:[%s1264_s5 + $0x10] sm:$0xff]  ;;  %v608_v22 = vld [vmem:[%s1264_s5 + $0x18] sm:$0xff] }
  0x1e   : > { %325 = vrot.lane.b32.xlu0 %v277_v15, %s1001_s20  ;;  %868 = vmatprep.subr.bf16.mxu0 %v867_v31  ;;  %v885_v15 = vpack.c.bf16 %v606_v14, %v605_v13 }
  0x1f   : > { %884 = vmatprep.subr.bf16.mxu1 %v1004_v49 }
  0x21   : > { %333 = vrot.lane.b32.xlu1 %v320_v27, %s1003_s21  ;;  %870 = vmatpush3.bf16.msra.mxu0 %v867_v31  ;;  %s270_s21 = scalar_lea.vmem [#allocation4], %s269_s16 }
  0x22   : > { %872 = vmatprep.subr.bf16.mxu0 %v871_v34  ;;  %s697_s22 = sshll.u32 %s270_s21, 4  ;;  %s1219_s22 = int_to_ptr.vmem [resolvable:$true] %s697_s22 }
  0x23   : > { %s937_s9 = scalar_lea.vmem %s1219_s22, 16  ;;  %p944_p0 = scmp.lt.s32.totalorder %s1219_s22, %s942_s13 }
  0x24   : > { %p938_p11 = scmp.ne.s32.totalorder %s1219_s22, %s937_s9 }
  0x25   : > { %874 = vmatpush3.bf16.msra.mxu0 %v871_v34 }
  0x26   : > { %p939_p12 = pnand %p938_p11, %p1088_p5 }
  0x28   : > { %p940_p13 = pneg %p939_p12 }
  0x8c   : > { %v324_v38 = vpop.permute.xlu0 %323 }
  0x8d   : > { %v338_v39 = vsel %vm337_vm4, %v312_v37, %v324_v38 }
  0x8f   : > { %v332_v40 = vpop.permute.xlu1 %331 }
  0x90   : > { %v341_v41 = vsel %vm340_vm5, %v338_v39, %v332_v40  ;;  %v326_v42 = vpop.permute.xlu0 %325 }
  0x91   : > { %822 = vmatprep.mubr.msk.f32.mxu0 %vm362_vm6, %v341_v41  ;;  %v339_v43 = vsel %vm337_vm4, %v310_v30, %v326_v42  ;;  %v609_v42 = vld [vmem:[%s1265_s6] sm:$0x1] }
  0x93   : > { %v334_v44 = vpop.permute.xlu1 %333 }
  0x94   : > { %v342_v45 = vsel %vm340_vm5, %v339_v43, %v334_v44 }
  0x95   : > { %823 = vmatmul.mubr.msk.f32.vlgmr.msra.gmra.mrb[0].mxu0 %vm362_vm6, %v342_v45 }
 0x168   : > { %v824_v54 = vpop.f32.mrb[0].mxu0 }
 0x169   : > { %v441_v55 = vadd.f32 %v824_v54, %v760_v53  ;;  %v435_v56 = vpop.f32.mrb[1].mxu0 }
 0x16a   : > { %v436_v57 = vadd.f32 %v760_v53, %v435_v56 }
 0x16b   : > { %v445_v60 = vmax.f32 %v441_v55, 0.0 }
 0x16c   : > { %v444_v62 = vmax.f32 %v436_v57, 0.0 }
 0x16d   : > { %448 = vst.msk [vmem:[#allocation2 + $0x8] sm:$0xff] %vm446_vm7, %v445_v60 }
 0x16e   : > { %447 = vst.msk [vmem:[#allocation2] sm:$0xff] %vm446_vm7, %v444_v62 }
 0x175   : > { %v449_v0 = vld [vmem:[#allocation2] ss:$2 sm:$0xff]  ;;  %v451_v1 = vld [vmem:[#allocation2 + $0x1] ss:$2 sm:$0xff] }
 0x176   : > { %v452_v2 = vmax.f32 %v449_v0, %v451_v1 }
 0x178   : > { %471 = vrot.lane.b32.xlu0 %v452_v2, %s1006_s17  ;;  %v468_v5 = vrot.slane %v452_v2, 1  ;;  %v466_v7 = vrot.slane %v452_v2, 7 }
 0x17a   : > { %v469_v8 = vmul.f32 %v764_v3, %v468_v5  ;;  %v467_v9 = vmul.f32 %v763_v4, %v466_v7 }
 0x17c   : > { %475 = vrot.lane.b32.xlu1 %v469_v8, %s1001_s20 }
 0x1ea   : > { %v472_v10 = vpop.permute.xlu0 %471 }
 0x1eb   : > { %v478_v6 = vsel %vm446_vm7, %v467_v9, %v472_v10 }
 0x1ee   : > { %v476_v11 = vpop.permute.xlu1 %475 }
 0x1ef   : > { %v479_v12 = vsel %vm337_vm4, %v478_v6, %v476_v11 }
 0x1f0   : > { %838 = vmatmul.mubr.msk.f32.vlgmr.msra.gmra.mrb[0].mxu1 %vm493_vm11, %v479_v12 }
 0x1f1   : > { %848 = vmatprep.mubr.msk.f32.mxu1 %vm1005_vm8, %v1002_v23  ;;  %886 = vmatpush3.bf16.msra.mxu1 %v885_v15  ;;  %v888_v23 = vpack.c.bf16 %v608_v22, %v607_v21 }
 0x1f2   : > { %887 = vmatprep.subr.bf16.mxu1 %v1004_v49 }
 0x1f5   : > { %889 = vmatpush3.bf16.msra.mxu1 %v888_v23 }
 0x2c3   : > { %v563_v17 = vpop.f32.mrb[0].mxu1 }
 0x2c4   : > { %v564_v18 = vadd.f32 %v765_v16, %v563_v17  ;;  %v839_v19 = vpop.f32.mrb[1].mxu1 }
 0x2c6   : > { %v567_v20 = vmax.f32 %v564_v18, 0.0 }
 0x2c8   : > { %569 = vst.msk [vmem:[#allocation3] sm:$0xff] %vm568_vm12, %v567_v20 }
 0x2cf   : > { %v580_v24 = vld [vmem:[#allocation3 + $0x4] ss:$8 sm:$0x1]  ;;  %v582_v25 = vld [vmem:[#allocation3 + $0x5] ss:$8 sm:$0x1] }
 0x2d0   : > { %v583_v26 = vmax.f32 %v580_v24, %v582_v25  ;;  %v575_v27 = vld [vmem:[#allocation3 + $0x2] ss:$8 sm:$0x1]  ;;  %v577_v28 = vld [vmem:[#allocation3 + $0x3] ss:$8 sm:$0x1] }
 0x2d1   : > { %v578_v29 = vmax.f32 %v575_v27, %v577_v28  ;;  %v585_v30 = vld [vmem:[#allocation3 + $0x6] ss:$8 sm:$0x1]  ;;  %v587_v31 = vld [vmem:[#allocation3 + $0x7] ss:$8 sm:$0x1] }
 0x2d2   : > { %594 = vrot.lane.b32.xlu1 %v583_v26, %s1006_s17  ;;  %v588_v32 = vmax.f32 %v585_v30, %v587_v31  ;;  %v570_v33 = vld [vmem:[#allocation3] ss:$8 sm:$0x1]  ;;  %v572_v34 = vld [vmem:[#allocation3 + $0x1] ss:$8 sm:$0x1] }
 0x2d3   : > { %590 = vrot.lane.b32.xlu0 %v578_v29, %s1007_s14  ;;  %v573_v35 = vmax.f32 %v570_v33, %v572_v34  ;;  %s943_s14 = scalar_lea.vmem %s942_s13, 32 }
 0x2d4   : > { %p945_p1 = scmp.lt.s32.totalorder %s943_s14, %s937_s9 }
 0x2d6   : > { %p946_p2 = por %p945_p1, %p944_p0 }
 0x2d7   : > { %598 = vrot.lane.b32.xlu0 %v588_v32, %s1008_s15 }
 0x2d8   : > { %p947_p3 = pnand %p946_p2, %p940_p13 }
 0x344   : > { %v595_v37 = vpop.permute.xlu1 %594 }
 0x345   : > { %v591_v36 = vpop.permute.xlu0 %590 }
 0x346   : > { %v601_v38 = vsel %vm568_vm12, %v573_v35, %v591_v36 }
 0x347   : > { %v602_v40 = vsel %vm446_vm7, %v601_v38, %v595_v37 }
 0x349   : > { %v599_v39 = vpop.permute.xlu0 %598 }
 0x34a   : > { %v604_v41 = vsel %vm603_vm13, %v602_v40, %v599_v39 }
 0x34b   : > { %849 = vmatmul.mubr.msk.f32.vlgmr.msra.gmra.mrb[2].mxu1 %vm337_vm4, %v604_v41 }
 0x41e   : > { %v679_v43 = vpop.f32.mrb[2].mxu1 }
 0x41f   : > { %v680_v44 = vadd.f32 %v679_v43, %v609_v42  ;;  %v850_v45 = vpop.f32.mrb[3].mxu1 }
 0x421   : > { %683 = vst [vmem:[%s270_s21] sm:$0x1] %v680_v44 }
 0x422   : > { %950 = shalt.err (!%p947_p3)
}
 0x423   : > { %s951_s15 = scalar_lea.hbm %s1217_s29, 16  ;;  %s955_s18 = scalar_lea.hbm %s1266_s7, 32 }
 0x424   : > { %p952_p4 = scmp.ne.s32.totalorder %s1217_s29, %s951_s15  ;;  %p956_p9 = scmp.lt.u32.totalorder %s1217_s29, %s1266_s7 }
 0x425   : > { %p957_p10 = scmp.lt.u32.totalorder %s955_s18, %s951_s15  ;;  %p959_p12 = scmp.lt.u32.totalorder %s951_s15, %s1217_s29 }
 0x426   : > { %p953_p7 = pnand %p952_p4, %p1088_p5 }
 0x427   : > { %p958_p11 = por %p957_p10, %p956_p9 }
 0x428   : > { %p954_p8 = pneg %p953_p7 }
 0x429   : > { %p960_p13 = por %p959_p12, %p958_p11 }
 0x42b   : > { %p961_p0 = pnand %p960_p13, %p954_p8 }
 0x42d   : > { %964 = shalt.err (!%p961_p0)
}
 0x42e   : > { %890 = dma.vmem_to_hbm [thread:$0]  (%p1088_p5), %s1219_s22, 16, %s1217_s29, %s685_s8  }
 0x42f PF: > { %p896_p1 = scmp.ge.s32.totalorder %s999_s27, 2  ;;  %s709_s20 = sand.u32 1, %s987_s24  }
 0x430   : > { %s710_s23 = scalar_lea.sflag [#allocation5], %s709_s20 }
 0x431   : > { %p893_p2 = pnand %p896_p1, %p1092_p6 }
 0x433   : > { %982 = dma.done.wait (!%p893_p2), %s710_s23, 16  }
 0x434   : > { %984 = vsyncadd (!%p893_p2), %s710_s23, 4294967280  ;;  %p17_p3 = scmp.ge.s32.totalorder %s1075_s30, 4   ;;  %s1269_s24 = smov %s991_s25 }
 0x435   : > { %s1270_s25 = smov %s995_s26  ;;  %s1271_s26 = smov %s1086_s10 }
 0x436   : > { %s1272_s27 = smov %s1075_s30  ;;  %19 = sbr.rel (!%p17_p3) target bundleno = 3 (0x3), region = 91 }
 0x43d   :  { %714 = vsyncpa [#allocation5], 1 }
 0x43e   :  { %716 = vsyncpa [#allocation5 + $0x1], 1 }

</bundles_post_ra>
